<compile_context>
chip_gen: v7x
topology: tpu7x:2x2x1
jax: 0.10.0
libtpu: 0.0.40
codegen_flags: <defaults>
</compile_context>

<pallas_src>
import jax
import jax.numpy as jnp
from jax.experimental import pallas as pl
from jax.experimental.pallas import tpu as pltpu


def _round_up(x, m):
    return (x + m - 1) // m * m


def _mlp_kernel(x_ref, w1_ref, b1_ref, w2_ref, b2_ref, out_ref):
    # fc1 (MXU) + bias/ReLU (VPU) + fc2 (MXU) + bias, all in VMEM, f32 accumulation.
    x = x_ref[...]                                                    # (TB, I)
    h = jnp.dot(x, w1_ref[...], preferred_element_type=jnp.float32)  # (TB, H) f32
    h = jnp.maximum(h + b1_ref[...], 0.0)                            # bias + relu, f32
    h = h.astype(w2_ref.dtype)                                       # bf16 path if enabled
    o = jnp.dot(h, w2_ref[...], preferred_element_type=jnp.float32)  # (TB, C_pad) f32
    o = o + b2_ref[...]
    # Store only the real classes: write back C columns instead of the
    # 128-wide MXU slab (16x less HBM write traffic at C=8; the masked
    # vst cost is negligible next to that).
    num_classes = out_ref.shape[1]
    out_ref[...] = o[:, :num_classes].astype(out_ref.dtype)


def prepare_params(w1, b1, w2, b2, *, compute_dtype=None):
    """One-time parameter preprocessing (call once, reuse across forwards).

    w1: (I, H), b1: (H,)   -- fc1, weight pre-transposed to [in, out]
    w2: (H, C), b2: (C,)   -- fc2, weight pre-transposed to [in, out]
    compute_dtype: optional dtype (e.g. jnp.bfloat16) for the MXU operands;
                   accumulation and bias/ReLU stay f32.
    """
    I, H = w1.shape
    H2, C = w2.shape
    assert H2 == H
    cd = jnp.float32 if compute_dtype is None else compute_dtype

    # Lane-dense fc2 for the MXU; only the real C columns are ever stored.
    C_pad = _round_up(C, 128)
    w1p = w1.astype(cd)
    w2p = jnp.pad(w2, ((0, 0), (0, C_pad - C))).astype(cd)
    b1p = b1.reshape(1, H).astype(jnp.float32)
    b2p = jnp.pad(b2.reshape(1, C), ((0, 0), (0, C_pad - C))).astype(jnp.float32)
    return (w1p, b1p, w2p, b2p, C)


def neural_net_forward(x, params, *, tile_batch=2048):
    """MLP forward. x: (B, I); params from prepare_params()."""
    w1, b1_2d, w2, b2_2d, num_classes = params
    B, I = x.shape
    H = w1.shape[1]
    C_pad = w2.shape[1]
    C = num_classes

    # Prefer casting x at the producer (avoids a separate HBM round-trip);
    # this is only a fallback so mixed-dtype calls still work.
    if x.dtype != w1.dtype:
        x = x.astype(w1.dtype)

    out_dtype = jnp.float32

    if B <= tile_batch:
        # Overhead-minimal path: no grid, no software pipeline, everything
        # resident in VMEM for the single invocation.
        return pl.pallas_call(
            _mlp_kernel,
            out_shape=jax.ShapeDtypeStruct((B, C), out_dtype),
            in_specs=[pl.BlockSpec(memory_space=pltpu.MemorySpace.VMEM)] * 5,
            out_specs=pl.BlockSpec(memory_space=pltpu.MemorySpace.VMEM),
        )(x, w1, b1_2d, w2, b2_2d)

    # Batch-tiled serving path: weights/biases resident (constant index_map ->
    # no per-step DMA), x/out streamed per batch tile, ragged tail handled by
    # the cdiv grid (no wrapper-side padding copy of x), batch axis "parallel".
    # VMEM budget per step (f32, TB=2048, I=H=32, C_pad=128):
    #   x 2*256 KiB + out 2*64 KiB + w1/w2/biases ~20 KiB + (TB,H)/(TB,C_pad)
    #   intermediates ~1.3 MiB  -> well under the 32 MiB scoped default on all
    #   of v5e/v6e/v7x.
    TB = tile_batch
    return pl.pallas_call(
        _mlp_kernel,
        out_shape=jax.ShapeDtypeStruct((B, C), out_dtype),
        grid=(pl.cdiv(B, TB),),
        in_specs=[
            pl.BlockSpec((TB, I), lambda i: (i, 0)),       # stream batch tiles
            pl.BlockSpec((I, H), lambda i: (0, 0)),        # resident fc1 weight
            pl.BlockSpec((1, H), lambda i: (0, 0)),        # resident fc1 bias
            pl.BlockSpec((H, C_pad), lambda i: (0, 0)),    # resident fc2 weight
            pl.BlockSpec((1, C_pad), lambda i: (0, 0)),    # resident fc2 bias
        ],
        out_specs=pl.BlockSpec((TB, C), lambda i: (i, 0)),
        compiler_params=pltpu.CompilerParams(
            dimension_semantics=("parallel",),
        ),
    )(x, w1, b1_2d, w2, b2_2d)


def _reference(x, w1, b1, w2, b2):
    h = jnp.maximum(x @ w1 + b1, 0.0)
    return h @ w2 + b2


if __name__ == "__main__":
    # Shapes consistent with the module: bag-of-words input -> hidden -> classes.
    batch = 2
    input_size = 32     # number of unique words
    hidden_size = 32
    num_classes = 8     # number of intent tags

    key = jax.random.PRNGKey(0)
    kx, k1, k2, k3, k4, kb = jax.random.split(key, 6)

    x = jax.random.normal(kx, (batch, input_size), dtype=jnp.float32)

    # Deterministic parameter init (PyTorch-Linear-style uniform bounds).
    bound1 = 1.0 / jnp.sqrt(input_size)
    bound2 = 1.0 / jnp.sqrt(hidden_size)
    w1 = jax.random.uniform(k1, (input_size, hidden_size), jnp.float32, -bound1, bound1)
    b1 = jax.random.uniform(k2, (hidden_size,), jnp.float32, -bound1, bound1)
    w2 = jax.random.uniform(k3, (hidden_size, num_classes), jnp.float32, -bound2, bound2)
    b2 = jax.random.uniform(k4, (num_classes,), jnp.float32, -bound2, bound2)

    # One-time parameter prep (f32, exact PyTorch numerics).
    params_f32 = prepare_params(w1, b1, w2, b2)

    # 1) Small-batch (no-grid) path at the module's toy shape.
    out = neural_net_forward(x, params_f32)
    out = jax.block_until_ready(out)
    ref = _reference(x, w1, b1, w2, b2)
    assert out.shape == (batch, num_classes)
    assert jnp.allclose(out, ref, atol=1e-5, rtol=1e-5)

    # 2) Batch-tiled serving path: cdiv grid with a ragged tail tile (300/128),
    #    weights resident, narrow (unpadded) output writeback. tile_batch is
    #    deliberately small here to exercise the grid path at toy sizes.
    big_batch = 300
    xb = jax.random.normal(kb, (big_batch, input_size), dtype=jnp.float32)
    out_b = neural_net_forward(xb, params_f32, tile_batch=128)
    out_b = jax.block_until_ready(out_b)
    ref_b = _reference(xb, w1, b1, w2, b2)
    assert out_b.shape == (big_batch, num_classes)
    assert jnp.allclose(out_b, ref_b, atol=1e-5, rtol=1e-5)

    # 3) bf16 serving path: MXU operands bf16 (x cast at the producer),
    #    accumulation f32, f32 logits out. Looser tolerance vs the f32 reference.
    params_bf16 = prepare_params(w1, b1, w2, b2, compute_dtype=jnp.bfloat16)
    xb_bf16 = xb.astype(jnp.bfloat16)
    out_bf = neural_net_forward(xb_bf16, params_bf16, tile_batch=128)
    out_bf = jax.block_until_ready(out_bf)
    assert out_bf.shape == (big_batch, num_classes)
    assert jnp.allclose(out_bf, ref_b, atol=1e-1, rtol=5e-2)

    print("KERNEL_OK")
</pallas_src>

<mosaic_0001>
module attributes {stable_mosaic.version = 11 : i64} {
  func.func @_mlp_kernel(%arg0: memref<2x32xf32, #tpu.memory_space<vmem>>, %arg1: memref<32x32xf32, #tpu.memory_space<vmem>>, %arg2: memref<1x32xf32, #tpu.memory_space<vmem>>, %arg3: memref<32x128xf32, #tpu.memory_space<vmem>>, %arg4: memref<1x128xf32, #tpu.memory_space<vmem>>, %arg5: memref<2x8xf32, #tpu.memory_space<vmem>>) attributes {dimension_semantics = [], scalar_prefetch = 0 : i64, scratch_operands = 0 : i64, tpu.core_type = #tpu.core_type<tc>} {
    %c0 = arith.constant 0 : index
    %c0_0 = arith.constant 0 : index
    %0 = vector.load %arg0[%c0, %c0_0] : memref<2x32xf32, #tpu.memory_space<vmem>>, vector<2x32xf32>
    %c0_1 = arith.constant 0 : index
    %c0_2 = arith.constant 0 : index
    %1 = vector.load %arg1[%c0_1, %c0_2] : memref<32x32xf32, #tpu.memory_space<vmem>>, vector<32x32xf32>
    %cst = arith.constant dense<0.000000e+00> : vector<2x32xf32>
    %2 = tpu.matmul %0, %1, %cst {dimension_numbers = #tpu.dot_dimension_numbers<[1], [0], [0], [1], [0, 0, 1, 1], [], []>} : vector<2x32xf32>, vector<32x32xf32>, vector<2x32xf32> -> vector<2x32xf32>
    %c0_3 = arith.constant 0 : index
    %c0_4 = arith.constant 0 : index
    %3 = vector.load %arg2[%c0_3, %c0_4] : memref<1x32xf32, #tpu.memory_space<vmem>>, vector<1x32xf32>
    %4 = vector.broadcast %3 : vector<1x32xf32> to vector<2x32xf32>
    %5 = arith.addf %2, %4 : vector<2x32xf32>
    %cst_5 = arith.constant 0.000000e+00 : f32
    %6 = vector.broadcast %cst_5 : f32 to vector<2x32xf32>
    %7 = arith.maximumf %5, %6 : vector<2x32xf32>
    %c0_6 = arith.constant 0 : index
    %c0_7 = arith.constant 0 : index
    %8 = vector.load %arg3[%c0_6, %c0_7] : memref<32x128xf32, #tpu.memory_space<vmem>>, vector<32x128xf32>
    %cst_8 = arith.constant dense<0.000000e+00> : vector<2x128xf32>
    %9 = tpu.matmul %7, %8, %cst_8 {dimension_numbers = #tpu.dot_dimension_numbers<[1], [0], [0], [1], [0, 0, 1, 1], [], []>} : vector<2x32xf32>, vector<32x128xf32>, vector<2x128xf32> -> vector<2x128xf32>
    %c0_9 = arith.constant 0 : index
    %c0_10 = arith.constant 0 : index
    %10 = vector.load %arg4[%c0_9, %c0_10] : memref<1x128xf32, #tpu.memory_space<vmem>>, vector<1x128xf32>
    %11 = vector.broadcast %10 : vector<1x128xf32> to vector<2x128xf32>
    %12 = arith.addf %9, %11 : vector<2x128xf32>
    %13 = vector.extract_strided_slice %12 {offsets = [0, 0], sizes = [2, 8], strides = [1, 1]} : vector<2x128xf32> to vector<2x8xf32>
    %c0_11 = arith.constant 0 : index
    %c0_12 = arith.constant 0 : index
    %14 = vector.load %arg5[%c0_11, %c0_12] : memref<2x8xf32, #tpu.memory_space<vmem>>, vector<2x8xf32>
    tpu.vector_store %arg5[%c0_11, %c0_12], %13 {strides = array<i32>} : memref<2x8xf32, #tpu.memory_space<vmem>>, vector<2x8xf32>,
    return
  }
}

</mosaic_0001>

<bundles_post_ra>
// kernel: tpu_custom_call.1
= control target key start
LH: loop header
LB: loop body
LE: loop exit
PB: predicated region body
PF: predicated region fallthrough
CT: control target
= control target key end

     0   :  { %10 = vsyncpa [#allocation3], 0  ;;  %s499_s0 = inlined_call_operand.hbm [shape: f32[2,32], index: 0, kind: input, shape index: {}]   ;;  %s500_s1 = inlined_call_operand.hbm [shape: f32[32,32], index: 1, kind: input, shape index: {}]   ;;  %s501_s2 = inlined_call_operand.vmem [shape: f32[1,32], index: 2, kind: input, shape index: {}]   ;;  %s502_s3 = inlined_call_operand.hbm [shape: f32[32,128], index: 3, kind: input, shape index: {}]   ;;  %s503_s4 = inlined_call_operand.vmem [shape: f32[1,128], index: 4, kind: input, shape index: {}]   ;;  %s504_s5 = inlined_call_operand.hbm [shape: f32[2,8], index: 5, kind: output, shape index: {}]  }
   0x1   :  { %11 = vsyncpa [#allocation6], 0 }
   0x2   :  { %12 = vsyncpa [#allocation4], 0  ;;  %s400_s18 = smov [#allocation5]   ;;  %s306_s22 = scalar_lea.hbm %s500_s1, 512 }
   0x3   :  { %s28_s19 = sshll.u32 %s400_s18, 4  ;;  %p307_p0 = scmp.ne.s32.totalorder %s500_s1, %s306_s22  ;;  %s29_s19 = int_to_ptr.vmem [resolvable:$true] %s28_s19 }
   0x4   :  { %p310_p1 = scmp.lt.u32.totalorder %s306_s22, %s500_s1 }
   0x6   :  { %p312_p2 = pnand %p310_p1, %p307_p0 }
   0x8   :  { %315 = shalt.err (!%p312_p2)
}
   0x9   :  { %s316_s27 = scalar_lea.vmem %s29_s19, 512  ;;  %p321_p4 = scmp.lt.s32.totalorder %s29_s19, %s29_s19 }
   0xa   :  { %p317_p3 = scmp.ne.s32.totalorder %s29_s19, %s316_s27  ;;  %p322_p5 = scmp.lt.s32.totalorder %s316_s27, %s316_s27 }
   0xc   :  { %p323_p6 = por %p322_p5, %p321_p4 }
   0xe   :  { %p324_p7 = pnand %p323_p6, %p317_p3 }
  0x10   :  { %327 = shalt.err (!%p324_p7)
}
  0x11   :  { %s401_s28 = smov 128   ;;  %s402_s29 = smov 8  }
  0x12   :  { %34 = dma.hbm_to_vmem [thread:$0]  %s500_s1, 512, %s29_s19, [#allocation6], %s401_s28, %s401_s28, %s402_s29  }
  0x13   :  { %s403_s7 = smov [#allocation2]   ;;  %s404_s9 = smov [#allocation7]  }
  0x14   :  { %s19_s8 = sshll.u32 %s403_s7, 4  ;;  %s42_s10 = sshll.u32 %s404_s9, 4  ;;  %s20_s8 = int_to_ptr.vmem [resolvable:$true] %s19_s8  ;;  %s43_s10 = int_to_ptr.vmem [resolvable:$true] %s42_s10 }
  0x15   :  { %s328_s13 = scalar_lea.hbm %s499_s0, 32 }
  0x16   :  { %p329_p8 = scmp.ne.s32.totalorder %s499_s0, %s328_s13  ;;  %p332_p9 = scmp.lt.u32.totalorder %s328_s13, %s499_s0 }
  0x18   :  { %p334_p10 = pnand %p332_p9, %p329_p8 }
  0x1a   :  { %337 = shalt.err (!%p334_p10)
}
  0x1b   :  { %s338_s1 = scalar_lea.vmem %s20_s8, 32  ;;  %p343_p12 = scmp.lt.s32.totalorder %s20_s8, %s20_s8 }
  0x1c   :  { %p339_p11 = scmp.ne.s32.totalorder %s20_s8, %s338_s1  ;;  %p344_p13 = scmp.lt.s32.totalorder %s338_s1, %s338_s1 }
  0x1e   :  { %p345_p0 = por %p344_p13, %p343_p12 }
  0x20   :  { %p346_p1 = pnand %p345_p0, %p339_p11 }
  0x22   :  { %349 = shalt.err (!%p346_p1)
}
  0x23   :  { %22 = dma.hbm_to_vmem [thread:$0]  %s499_s0, 32, %s20_s8, [#allocation3]  }
  0x24   :  { %s350_s22 = scalar_lea.hbm %s502_s3, 512 }
  0x25   :  { %p351_p2 = scmp.ne.s32.totalorder %s502_s3, %s350_s22  ;;  %p354_p3 = scmp.lt.u32.totalorder %s350_s22, %s502_s3 }
  0x27   :  { %p356_p4 = pnand %p354_p3, %p351_p2 }
  0x29   :  { %359 = shalt.err (!%p356_p4)
}
  0x2a   :  { %s360_s27 = scalar_lea.vmem %s43_s10, 512  ;;  %p365_p6 = scmp.lt.s32.totalorder %s43_s10, %s43_s10 }
  0x2b   :  { %p361_p5 = scmp.ne.s32.totalorder %s43_s10, %s360_s27  ;;  %p366_p7 = scmp.lt.s32.totalorder %s360_s27, %s360_s27 }
  0x2d   :  { %p367_p8 = por %p366_p7, %p365_p6 }
  0x2f   :  { %p368_p9 = pnand %p367_p8, %p361_p5 }
  0x31   :  { %371 = shalt.err (!%p368_p9)
}
  0x32   :  { %48 = dma.hbm_to_vmem [thread:$0]  %s502_s3, 512, %s43_s10, [#allocation6], %s401_s28, %s401_s28, %s402_s29  }
  0x33   :  { %394 = dma.done.wait [#allocation3], 32  }
  0x34   :  { %395 = vsyncadd [#allocation3], 4294967264 }
  0x35   :  { %396 = dma.done.wait [#allocation6], 1024  }
  0x36   :  { %397 = vsyncadd [#allocation6], 4294966272  ;;  %v405_v0 = vmov 0.0|0.0   ;;  %vm406_vm0 = vmmov 0   ;;  %v407_v1 = vmov 0.0   ;;  %v61_v2 = vld [vmem:[#allocation5] sm:$0xff] }
  0x37   :  { %285 = vmatprep.subr.bf16.mxu0 %v405_v0  ;;  %271 = vmatprep.mubr.msk.f32.mxu0 %vm406_vm0, %v407_v1  ;;  %v62_v3 = vld [vmem:[#allocation5 + $0x8] sm:$0xff]  ;;  %v63_v4 = vld [vmem:[#allocation5 + $0x10] sm:$0xff]  ;;  %v64_v6 = vld [vmem:[#allocation5 + $0x18] sm:$0xff]  ;;  %vm72_vm1 = vcmask 261120   ;;  %s408_s7 = smov [#allocation8]   ;;  %vm231_vm2 = vcmask 58368  }
  0x38   :  { %291 = vmatprep.subr.bf16.mxu1 %v405_v0  ;;  %282 = vmatprep.mubr.msk.f32.mxu1 %vm406_vm0, %v407_v1  ;;  %v286_v5 = vpack.c.bf16 %v62_v3, %v61_v2  ;;  %v147_v7 = vld [vmem:[#allocation7] sm:$0xff]  ;;  %v148_v8 = vld [vmem:[#allocation7 + $0x8] sm:$0xff]  ;;  %v289_v9 = vpack.c.bf16 %v64_v6, %v63_v4  ;;  %v60_v11 = vld [vmem:[#allocation2] sm:$0x3]  ;;  %s239_s8 = sshll.u32 %s408_s7, 4  ;;  %s240_s8 = int_to_ptr.vmem [resolvable:$true] %s239_s8 }
  0x39   :  { %v292_v10 = vpack.c.bf16 %v148_v8, %v147_v7  ;;  %v149_v12 = vld [vmem:[#allocation7 + $0x10] sm:$0xff]  ;;  %v150_v13 = vld [vmem:[#allocation7 + $0x18] sm:$0xff]  ;;  %s372_s9 = scalar_lea.vmem %s240_s8, 32  ;;  %p377_p11 = scmp.lt.s32.totalorder %s240_s8, %s240_s8 }
  0x3a   :  { %287 = vmatpush3.bf16.msra.mxu0 %v286_v5  ;;  %v295_v14 = vpack.c.bf16 %v150_v13, %v149_v12  ;;  %v249_v15 = vld [vmem:[%s501_s2] ss:$0 sm:$0xff]  ;;  %p373_p10 = scmp.ne.s32.totalorder %s240_s8, %s372_s9  ;;  %p378_p12 = scmp.lt.s32.totalorder %s372_s9, %s372_s9 }
  0x3b   :  { %288 = vmatprep.subr.bf16.mxu0 %v405_v0  ;;  %293 = vmatpush3.bf16.msra.mxu1 %v292_v10  ;;  %v251_v20 = vld [vmem:[%s503_s4] ss:$0 sm:$0xff] }
  0x3c   :  { %294 = vmatprep.subr.bf16.mxu1 %v405_v0  ;;  %p379_p13 = por %p378_p12, %p377_p11 }
  0x3e   :  { %290 = vmatpush3.bf16.msra.mxu0 %v289_v9  ;;  %p380_p0 = pnand %p379_p13, %p373_p10 }
  0x3f   :  { %296 = vmatpush3.bf16.msra.mxu1 %v295_v14 }
  0x41   :  { %272 = vmatmul.mubr.msk.f32.vlgmr.msra.gmra.mrb[0].mxu0 %vm72_vm1, %v60_v11 }
 0x114   :  { %v142_v16 = vpop.f32.mrb[0].mxu0 }
 0x115   :  { %v143_v17 = vadd.f32 %v249_v15, %v142_v16  ;;  %v273_v18 = vpop.f32.mrb[1].mxu0 }
 0x117   :  { %v146_v19 = vmax.f32 %v143_v17, 0.0 }
 0x119   :  { %283 = vmatmul.mubr.msk.f32.vlgmr.msra.gmra.mrb[0].mxu1 %vm72_vm1, %v146_v19 }
 0x1ec   :  { %v227_v21 = vpop.f32.mrb[0].mxu1 }
 0x1ed   :  { %v228_v22 = vadd.f32 %v251_v20, %v227_v21  ;;  %v284_v23 = vpop.f32.mrb[1].mxu1 }
 0x1ef   :  { %232 = vst.msk [vmem:[#allocation8] sm:$0x3] %vm231_vm2, %v228_v22 }
 0x1f0   :  { %383 = shalt.err (!%p380_p0)
}
 0x1f1   :  { %s384_s11 = scalar_lea.hbm %s504_s5, 32 }
 0x1f2   :  { %p385_p1 = scmp.ne.s32.totalorder %s504_s5, %s384_s11  ;;  %p388_p2 = scmp.lt.u32.totalorder %s384_s11, %s504_s5 }
 0x1f4   :  { %p390_p3 = pnand %p388_p2, %p385_p1 }
 0x1f6   :  { %393 = shalt.err (!%p390_p3)
}
 0x1f7   :  { %242 = dma.vmem_to_hbm [thread:$0]  %s240_s8, 32, %s504_s5, [#allocation4]  }
 0x1f8   :  { %398 = dma.done.wait [#allocation4], 32  }
 0x1f9   :  { %399 = vsyncadd [#allocation4], 4294967264 }
 0x1fa   :  { %246 = vsyncpa [#allocation3], 1 }
 0x1fb   :  { %247 = vsyncpa [#allocation6], 1 }
 0x1fc   :  { %248 = vsyncpa [#allocation4], 1 }

</bundles_post_ra>
